<compile_context>
chip_gen: v7x
topology: tpu7x:2x2x1
jax: 0.10.0
libtpu: 0.0.40
codegen_flags: <defaults>
</compile_context>

<pallas_src>
import functools
import math

import jax
import jax.numpy as jnp
from jax.experimental import pallas as pl
from jax.experimental.pallas import tpu as pltpu


EPS = 1e-5  # nn.InstanceNorm2d default eps


def _round_up(x, m):
    return (x + m - 1) // m * m


def _contracting_kernel(w_ref, xs_ref, o_ref, sum_ref, sumsq_ref, *,
                        n_row_tiles, wo, wg, p_real):
    """One grid step = (sample n, OC tile, row tile).

    w_ref:     (9, TOC, C)    bf16  per-tap weight matrices, j = kh*3 + kw
    xs_ref:    (1, 6, C, TQ)  bf16  stride-2 phase groups for this row tile
                                    (group g = 2*kh + column-parity, rows flattened (TH, Wg)->TQ)
    o_ref:     (1, TOC, Qp)   bf16  resident per-(n, OC-tile) output block: raw conv is staged,
                                    normalized + ReLU'd on the last row tile
    sum_ref:   (TOC, 1)       f32   running per-channel sum
    sumsq_ref: (TOC, 1)       f32   running per-channel sum of squares
    """
    t = pl.program_id(2)
    toc = o_ref.shape[1]
    tq = xs_ref.shape[-1]

    @pl.when(t == 0)
    def _init():
        sum_ref[...] = jnp.zeros_like(sum_ref)
        sumsq_ref[...] = jnp.zeros_like(sumsq_ref)

    # ---- conv: 9 taps -> 9 accumulating MXU matmuls (bf16 operands, f32 accumulation) --------
    acc = jnp.zeros((toc, tq), jnp.float32)
    for kh in range(3):
        xe = xs_ref[0, 2 * kh]        # (C, TQ) even-column group of kernel row kh
        xo = xs_ref[0, 2 * kh + 1]    # (C, TQ) odd-column group
        # kw = 0: even columns, unshifted
        acc += jnp.dot(w_ref[3 * kh + 0], xe, preferred_element_type=jnp.float32)
        # kw = 1: odd columns, unshifted
        acc += jnp.dot(w_ref[3 * kh + 1], xo, preferred_element_type=jnp.float32)
        # kw = 2: even columns shifted left by one output pixel.  Row-boundary leakage lands
        # only in the junk columns (w >= Wo), which are masked from the statistics and cropped
        # in the wrapper.
        xe_s = jnp.concatenate(
            [xe[:, 1:], jnp.zeros((xe.shape[0], 1), xe.dtype)], axis=1)
        acc += jnp.dot(w_ref[3 * kh + 2], xe_s, preferred_element_type=jnp.float32)

    # ---- per-channel statistics (junk columns w in [Wo, Wg) excluded; padded rows are 0) ------
    col = jax.lax.broadcasted_iota(jnp.int32, (1, tq), 1)
    valid = (col % wg) < wo
    yv = jnp.where(valid, acc, 0.0)
    sum_ref[...] += jnp.sum(yv, axis=-1, keepdims=True)
    sumsq_ref[...] += jnp.sum(yv * yv, axis=-1, keepdims=True)

    # ---- stage raw conv output into the resident block (128-aligned lane offset) --------------
    off = pl.multiple_of(t * tq, 128)
    o_ref[0, :, pl.ds(off, tq)] = acc.astype(o_ref.dtype)

    # ---- last row tile: normalize + ReLU the whole resident block, chunk by chunk -------------
    @pl.when(t == n_row_tiles - 1)
    def _finalize():
        inv_p = 1.0 / p_real
        mean = sum_ref[...] * inv_p                                    # (TOC, 1)
        var = jnp.maximum(sumsq_ref[...] * inv_p - mean * mean, 0.0)   # one-pass var, clamped
        inv_std = jax.lax.rsqrt(var + EPS)

        def body(i, carry):
            o = pl.multiple_of(i * tq, 128)
            blk = o_ref[0, :, pl.ds(o, tq)].astype(jnp.float32)
            blk = jnp.maximum((blk - mean) * inv_std, 0.0)
            o_ref[0, :, pl.ds(o, tq)] = blk.astype(o_ref.dtype)
            return carry

        jax.lax.fori_loop(0, n_row_tiles, body, 0)


def contracting_block(x, weight, bias=None):
    """Forward of ContractingBlock (use_bn=True, activation='relu').

    x: (N, C, H, W) f32, weight: (2C, C, 3, 3) f32.  bias cancels under InstanceNorm -> unused.
    Returns (N, 2C, H_out, W_out) bfloat16.
    """
    del bias  # InstanceNorm2d(affine=False) subtracts the per-channel mean -> bias cancels.
    N, C, H, W = x.shape
    OC, IC, KH, KW = weight.shape
    assert OC == 2 * C and IC == C and KH == 3 and KW == 3
    assert H >= 2 and W >= 2

    Ho = (H - 1) // 2 + 1    # (H + 2 - 3) // 2 + 1
    Wo = (W - 1) // 2 + 1
    P = Ho * Wo

    # ---- generation-aware VMEM budget ----------------------------------------------------------
    try:
        vmem_cap = int(pltpu.get_tpu_info().vmem_capacity_bytes)
    except Exception:  # noqa: BLE001 - fall back to the most conservative generation (v7x)
        vmem_cap = 64 * 1024 * 1024
    budget = int(vmem_cap * 0.85)

    # ---- tiling ---------------------------------------------------------------------------------
    # Stored group width: >= Wo + 1 (the kw=2 tap needs one extra even column) and a multiple of 8
    # so any row tile TH that is a multiple of 16 gives a 128-aligned lane tile TQ = TH * Wg.
    Wg = _round_up(Wo + 1, 8)

    # OC tile (2nd grid axis, "parallel"): bounds the resident output block (v7x 64 MiB VMEM) and
    # gives the second TensorCore work; per-channel stats make the split exact.
    TOC = OC
    for cand in (256, 128):
        if OC > cand and OC % cand == 0:
            TOC = cand
            break
    if N == 1 and TOC == OC and TOC % 32 == 0:
        TOC //= 2  # batch-1 megacore axis (costs one extra read of the input groups)

    # Row tile TH (output rows per grid step).
    if Ho < 32:
        TH, n_t = Ho, 1
    else:
        tgt_bytes = (2 << 20) if vmem_cap > (96 << 20) else (1 << 20)
        bytes_per_row = 6 * C * Wg * 2
        target_rows = max(16, min(256, tgt_bytes // max(1, bytes_per_row)))
        TH = max(16, (target_rows // 16) * 16)
        TH = min(TH, _round_up(Ho, 16))
        n_t = -(-Ho // TH)
        if n_t == 1:
            TH = Ho

    def vmem_need(th, toc, nt):
        tq = th * Wg
        qp = nt * tq
        return (2 * 6 * C * tq * 2       # input groups, double buffered (bf16)
                + 2 * 9 * toc * C * 2    # weights, double buffered (bf16)
                + 2 * toc * qp * 2       # resident output block, double buffered (bf16)
                + 2 * toc * 128 * 4      # stats scratch (lane-padded)
                + (8 << 20))             # headroom for compiler temporaries

    while vmem_need(TH, TOC, n_t) > budget:
        if n_t > 1 and TH > 16:
            TH -= 16
            n_t = -(-Ho // TH)
        elif TOC % 32 == 0 and TOC > 16:
            TOC //= 2
        else:
            break

    Ho_pad = n_t * TH
    TQ = TH * Wg
    Q_pad = Ho_pad * Wg
    n_oc = OC // TOC

    # ---- glue: reflect pad + stride-2 phase groups (no im2col materialization) -----------------
    # Group g = 2*kh + p holds x_pad[:, :, 2r+kh, 2w+p] at (row r, col w); even groups carry one
    # extra real column (for the kw=2 tap), remaining columns / rows are zero padding.
    x_pad = jnp.pad(x, ((0, 0), (0, 0), (1, 1), (1, 1)), mode="reflect")
    groups = []
    for kh in range(3):
        rows = x_pad[:, :, kh:kh + 2 * Ho:2, :]                   # (N, C, Ho, W+2)
        for p in range(2):
            g = rows[:, :, :, p::2]                                # (N, C, Ho, <= Wo+1)
            g = jnp.pad(g, ((0, 0), (0, 0),
                            (0, Ho_pad - Ho), (0, Wg - g.shape[-1])))
            groups.append(g)
    xs = jnp.stack(groups, axis=1).astype(jnp.bfloat16)            # (N, 6, C, Ho_pad, Wg)
    xs = xs.reshape(N, 6, C, Q_pad)

    # Per-tap weight matrices, j = kh*3 + kw.
    w9 = jnp.transpose(weight, (2, 3, 0, 1)).reshape(9, OC, C).astype(jnp.bfloat16)

    kernel = functools.partial(
        _contracting_kernel, n_row_tiles=n_t, wo=Wo, wg=Wg, p_real=float(P))

    out = pl.pallas_call(
        kernel,
        out_shape=jax.ShapeDtypeStruct((N, OC, Q_pad), jnp.bfloat16),
        grid_spec=pltpu.PrefetchScalarGridSpec(
            num_scalar_prefetch=0,
            grid=(N, n_oc, n_t),
            in_specs=[
                pl.BlockSpec((9, TOC, C), lambda n, o, t: (0, o, 0)),        # weights
                pl.BlockSpec((1, 6, C, TQ), lambda n, o, t: (n, 0, 0, t)),   # input groups
            ],
            out_specs=pl.BlockSpec((1, TOC, Q_pad), lambda n, o, t: (n, o, 0)),
            scratch_shapes=[
                pltpu.VMEM((TOC, 1), jnp.float32),    # per-channel sum
                pltpu.VMEM((TOC, 1), jnp.float32),    # per-channel sum of squares
            ],
        ),
        compiler_params=pltpu.CompilerParams(
            dimension_semantics=("parallel", "parallel", "arbitrary"),
            vmem_limit_bytes=budget,
        ),
        cost_estimate=pl.CostEstimate(
            flops=2 * N * OC * 9 * C * Ho * Wo,
            transcendentals=0,
            bytes_accessed=int(xs.size * 2 + w9.size * 2 + N * OC * Q_pad * 2),
        ),
    )(w9, xs)

    # Crop padding: (N, OC, Ho_pad * Wg) -> (N, OC, Ho, Wo).
    return out.reshape(N, OC, Ho_pad, Wg)[:, :, :Ho, :Wo]


def reference_block(x, weight, bias):
    """Pure-JAX reference (conv + bias + instance norm + relu) for validation."""
    x_pad = jnp.pad(x, ((0, 0), (0, 0), (1, 1), (1, 1)), mode="reflect")
    y = jax.lax.conv_general_dilated(
        x_pad, weight, window_strides=(2, 2), padding="VALID",
        dimension_numbers=("NCHW", "OIHW", "NCHW"))
    y = y + bias.reshape(1, -1, 1, 1)
    mean = jnp.mean(y, axis=(2, 3), keepdims=True)
    var = jnp.mean((y - mean) ** 2, axis=(2, 3), keepdims=True)
    y = (y - mean) * jax.lax.rsqrt(var + EPS)
    return jnp.maximum(y, 0.0)


if __name__ == "__main__":
    key = jax.random.PRNGKey(0)
    kx, kw, kb = jax.random.split(key, 3)

    N, C, H, W = 2, 4, 16, 16
    OC = 2 * C

    x = jax.random.normal(kx, (N, C, H, W), dtype=jnp.float32)
    # deterministic, PyTorch-Conv2d-like init scale
    fan_in = C * 3 * 3
    bound = 1.0 / math.sqrt(fan_in)
    weight = jax.random.uniform(kw, (OC, C, 3, 3), jnp.float32, -bound, bound)
    bias = jax.random.uniform(kb, (OC,), jnp.float32, -bound, bound)

    out = jax.block_until_ready(contracting_block(x, weight, bias))
    ref = jax.block_until_ready(reference_block(x, weight, bias))

    assert out.shape == (N, OC, H // 2, W // 2), out.shape
    out_f32 = out.astype(jnp.float32)
    max_err = float(jnp.max(jnp.abs(out_f32 - ref)))
    # bf16 MXU operands + bf16 staged/stored output -> looser tolerance than pure f32.
    assert jnp.allclose(out_f32, ref, atol=1e-1, rtol=1e-1), max_err

    print("KERNEL_OK")
</pallas_src>

<mosaic_0001>
module attributes {stable_mosaic.version = 11 : i64} {
  func.func @_contracting_kernel(%arg0: i32, %arg1: i32, %arg2: i32, %arg3: memref<9x8x4xbf16, #tpu.memory_space<vmem>>, %arg4: memref<1x6x4x128xbf16, #tpu.memory_space<vmem>>, %arg5: memref<1x8x128xbf16, #tpu.memory_space<vmem>>, %arg6: memref<8x1xf32, #tpu.memory_space<vmem>>, %arg7: memref<8x1xf32, #tpu.memory_space<vmem>>) attributes {dimension_semantics = [#tpu.dimension_semantics<parallel>, #tpu.dimension_semantics<parallel>, #tpu.dimension_semantics<arbitrary>], iteration_bounds = array<i64: 2, 1, 1>, scalar_prefetch = 0 : i64, scratch_operands = 2 : i64, tpu.core_type = #tpu.core_type<tc>, window_params = [{transform_indices = @transform_0, window_bounds = array<i64: 9, 8, 4>}, {transform_indices = @transform_1, window_bounds = array<i64: 1, 6, 4, 128>}, {transform_indices = @transform_2, window_bounds = array<i64: 1, 8, 128>}]} {
    %c0_i32 = arith.constant 0 : i32
    %0 = arith.cmpi eq, %arg2, %c0_i32 : i32
    %1 = arith.extui %0 : i1 to i32
    %c0_i32_0 = arith.constant 0 : i32
    %2 = arith.cmpi ne, %1, %c0_i32_0 : i32
    scf.if %2 {
      %cst_74 = arith.constant 0.000000e+00 : f32
      %105 = vector.broadcast %cst_74 : f32 to vector<8x1xf32>
      %c0_75 = arith.constant 0 : index
      %c0_76 = arith.constant 0 : index
      %106 = vector.load %arg6[%c0_75, %c0_76] : memref<8x1xf32, #tpu.memory_space<vmem>>, vector<8x1xf32>
      tpu.vector_store %arg6[%c0_75, %c0_76], %105 {strides = array<i32>} : memref<8x1xf32, #tpu.memory_space<vmem>>, vector<8x1xf32>,
      %cst_77 = arith.constant 0.000000e+00 : f32
      %107 = vector.broadcast %cst_77 : f32 to vector<8x1xf32>
      %c0_78 = arith.constant 0 : index
      %c0_79 = arith.constant 0 : index
      %108 = vector.load %arg7[%c0_78, %c0_79] : memref<8x1xf32, #tpu.memory_space<vmem>>, vector<8x1xf32>
      tpu.vector_store %arg7[%c0_78, %c0_79], %107 {strides = array<i32>} : memref<8x1xf32, #tpu.memory_space<vmem>>, vector<8x1xf32>,
    } else {
    }
    %cst = arith.constant 0.000000e+00 : f32
    %3 = vector.broadcast %cst : f32 to vector<8x128xf32>
    %c0 = arith.constant 0 : index
    %c0_1 = arith.constant 0 : index
    %c0_2 = arith.constant 0 : index
    %c0_3 = arith.constant 0 : index
    %4 = vector.load %arg4[%c0, %c0_1, %c0_2, %c0_3] : memref<1x6x4x128xbf16, #tpu.memory_space<vmem>>, vector<1x1x4x128xbf16>
    %5 = vector.shape_cast %4 : vector<1x1x4x128xbf16> to vector<4x128xbf16>
    %c0_4 = arith.constant 0 : index
    %c1 = arith.constant 1 : index
    %c0_5 = arith.constant 0 : index
    %c0_6 = arith.constant 0 : index
    %6 = vector.load %arg4[%c0_4, %c1, %c0_5, %c0_6] : memref<1x6x4x128xbf16, #tpu.memory_space<vmem>>, vector<1x1x4x128xbf16>
    %7 = vector.shape_cast %6 : vector<1x1x4x128xbf16> to vector<4x128xbf16>
    %c0_7 = arith.constant 0 : index
    %c0_8 = arith.constant 0 : index
    %c0_9 = arith.constant 0 : index
    %8 = vector.load %arg3[%c0_7, %c0_8, %c0_9] : memref<9x8x4xbf16, #tpu.memory_space<vmem>>, vector<1x8x4xbf16>
    %9 = vector.shape_cast %8 : vector<1x8x4xbf16> to vector<8x4xbf16>
    %cst_10 = arith.constant dense<0.000000e+00> : vector<8x128xf32>
    %10 = tpu.matmul %9, %5, %cst_10 {dimension_numbers = #tpu.dot_dimension_numbers<[1], [0], [0], [1], [0, 0, 1, 1], [], []>} : vector<8x4xbf16>, vector<4x128xbf16>, vector<8x128xf32> -> vector<8x128xf32>
    %11 = arith.addf %3, %10 : vector<8x128xf32>
    %c1_11 = arith.constant 1 : index
    %c0_12 = arith.constant 0 : index
    %c0_13 = arith.constant 0 : index
    %12 = vector.load %arg3[%c1_11, %c0_12, %c0_13] : memref<9x8x4xbf16, #tpu.memory_space<vmem>>, vector<1x8x4xbf16>
    %13 = vector.shape_cast %12 : vector<1x8x4xbf16> to vector<8x4xbf16>
    %cst_14 = arith.constant dense<0.000000e+00> : vector<8x128xf32>
    %14 = tpu.matmul %13, %7, %cst_14 {dimension_numbers = #tpu.dot_dimension_numbers<[1], [0], [0], [1], [0, 0, 1, 1], [], []>} : vector<8x4xbf16>, vector<4x128xbf16>, vector<8x128xf32> -> vector<8x128xf32>
    %15 = arith.addf %11, %14 : vector<8x128xf32>
    %16 = vector.extract_strided_slice %5 {offsets = [0, 1], sizes = [4, 127], strides = [1, 1]} : vector<4x128xbf16> to vector<4x127xbf16>
    %cst_15 = arith.constant 0.000000e+00 : bf16
    %17 = vector.broadcast %cst_15 : bf16 to vector<4x1xbf16>
    %18 = tpu.concatenate %16, %17 in 1 : vector<4x127xbf16>, vector<4x1xbf16> -> vector<4x128xbf16>
    %c2 = arith.constant 2 : index
    %c0_16 = arith.constant 0 : index
    %c0_17 = arith.constant 0 : index
    %19 = vector.load %arg3[%c2, %c0_16, %c0_17] : memref<9x8x4xbf16, #tpu.memory_space<vmem>>, vector<1x8x4xbf16>
    %20 = vector.shape_cast %19 : vector<1x8x4xbf16> to vector<8x4xbf16>
    %cst_18 = arith.constant dense<0.000000e+00> : vector<8x128xf32>
    %21 = tpu.matmul %20, %18, %cst_18 {dimension_numbers = #tpu.dot_dimension_numbers<[1], [0], [0], [1], [0, 0, 1, 1], [], []>} : vector<8x4xbf16>, vector<4x128xbf16>, vector<8x128xf32> -> vector<8x128xf32>
    %22 = arith.addf %15, %21 : vector<8x128xf32>
    %c0_19 = arith.constant 0 : index
    %c2_20 = arith.constant 2 : index
    %c0_21 = arith.constant 0 : index
    %c0_22 = arith.constant 0 : index
    %23 = vector.load %arg4[%c0_19, %c2_20, %c0_21, %c0_22] : memref<1x6x4x128xbf16, #tpu.memory_space<vmem>>, vector<1x1x4x128xbf16>
    %24 = vector.shape_cast %23 : vector<1x1x4x128xbf16> to vector<4x128xbf16>
    %c0_23 = arith.constant 0 : index
    %c3 = arith.constant 3 : index
    %c0_24 = arith.constant 0 : index
    %c0_25 = arith.constant 0 : index
    %25 = vector.load %arg4[%c0_23, %c3, %c0_24, %c0_25] : memref<1x6x4x128xbf16, #tpu.memory_space<vmem>>, vector<1x1x4x128xbf16>
    %26 = vector.shape_cast %25 : vector<1x1x4x128xbf16> to vector<4x128xbf16>
    %c3_26 = arith.constant 3 : index
    %c0_27 = arith.constant 0 : index
    %c0_28 = arith.constant 0 : index
    %27 = vector.load %arg3[%c3_26, %c0_27, %c0_28] : memref<9x8x4xbf16, #tpu.memory_space<vmem>>, vector<1x8x4xbf16>
    %28 = vector.shape_cast %27 : vector<1x8x4xbf16> to vector<8x4xbf16>
    %cst_29 = arith.constant dense<0.000000e+00> : vector<8x128xf32>
    %29 = tpu.matmul %28, %24, %cst_29 {dimension_numbers = #tpu.dot_dimension_numbers<[1], [0], [0], [1], [0, 0, 1, 1], [], []>} : vector<8x4xbf16>, vector<4x128xbf16>, vector<8x128xf32> -> vector<8x128xf32>
    %30 = arith.addf %22, %29 : vector<8x128xf32>
    %c4 = arith.constant 4 : index
    %c0_30 = arith.constant 0 : index
    %c0_31 = arith.constant 0 : index
    %31 = vector.load %arg3[%c4, %c0_30, %c0_31] : memref<9x8x4xbf16, #tpu.memory_space<vmem>>, vector<1x8x4xbf16>
    %32 = vector.shape_cast %31 : vector<1x8x4xbf16> to vector<8x4xbf16>
    %cst_32 = arith.constant dense<0.000000e+00> : vector<8x128xf32>
    %33 = tpu.matmul %32, %26, %cst_32 {dimension_numbers = #tpu.dot_dimension_numbers<[1], [0], [0], [1], [0, 0, 1, 1], [], []>} : vector<8x4xbf16>, vector<4x128xbf16>, vector<8x128xf32> -> vector<8x128xf32>
    %34 = arith.addf %30, %33 : vector<8x128xf32>
    %35 = vector.extract_strided_slice %24 {offsets = [0, 1], sizes = [4, 127], strides = [1, 1]} : vector<4x128xbf16> to vector<4x127xbf16>
    %cst_33 = arith.constant 0.000000e+00 : bf16
    %36 = vector.broadcast %cst_33 : bf16 to vector<4x1xbf16>
    %37 = tpu.concatenate %35, %36 in 1 : vector<4x127xbf16>, vector<4x1xbf16> -> vector<4x128xbf16>
    %c5 = arith.constant 5 : index
    %c0_34 = arith.constant 0 : index
    %c0_35 = arith.constant 0 : index
    %38 = vector.load %arg3[%c5, %c0_34, %c0_35] : memref<9x8x4xbf16, #tpu.memory_space<vmem>>, vector<1x8x4xbf16>
    %39 = vector.shape_cast %38 : vector<1x8x4xbf16> to vector<8x4xbf16>
    %cst_36 = arith.constant dense<0.000000e+00> : vector<8x128xf32>
    %40 = tpu.matmul %39, %37, %cst_36 {dimension_numbers = #tpu.dot_dimension_numbers<[1], [0], [0], [1], [0, 0, 1, 1], [], []>} : vector<8x4xbf16>, vector<4x128xbf16>, vector<8x128xf32> -> vector<8x128xf32>
    %41 = arith.addf %34, %40 : vector<8x128xf32>
    %c0_37 = arith.constant 0 : index
    %c4_38 = arith.constant 4 : index
    %c0_39 = arith.constant 0 : index
    %c0_40 = arith.constant 0 : index
    %42 = vector.load %arg4[%c0_37, %c4_38, %c0_39, %c0_40] : memref<1x6x4x128xbf16, #tpu.memory_space<vmem>>, vector<1x1x4x128xbf16>
    %43 = vector.shape_cast %42 : vector<1x1x4x128xbf16> to vector<4x128xbf16>
    %c0_41 = arith.constant 0 : index
    %c5_42 = arith.constant 5 : index
    %c0_43 = arith.constant 0 : index
    %c0_44 = arith.constant 0 : index
    %44 = vector.load %arg4[%c0_41, %c5_42, %c0_43, %c0_44] : memref<1x6x4x128xbf16, #tpu.memory_space<vmem>>, vector<1x1x4x128xbf16>
    %45 = vector.shape_cast %44 : vector<1x1x4x128xbf16> to vector<4x128xbf16>
    %c6 = arith.constant 6 : index
    %c0_45 = arith.constant 0 : index
    %c0_46 = arith.constant 0 : index
    %46 = vector.load %arg3[%c6, %c0_45, %c0_46] : memref<9x8x4xbf16, #tpu.memory_space<vmem>>, vector<1x8x4xbf16>
    %47 = vector.shape_cast %46 : vector<1x8x4xbf16> to vector<8x4xbf16>
    %cst_47 = arith.constant dense<0.000000e+00> : vector<8x128xf32>
    %48 = tpu.matmul %47, %43, %cst_47 {dimension_numbers = #tpu.dot_dimension_numbers<[1], [0], [0], [1], [0, 0, 1, 1], [], []>} : vector<8x4xbf16>, vector<4x128xbf16>, vector<8x128xf32> -> vector<8x128xf32>
    %49 = arith.addf %41, %48 : vector<8x128xf32>
    %c7 = arith.constant 7 : index
    %c0_48 = arith.constant 0 : index
    %c0_49 = arith.constant 0 : index
    %50 = vector.load %arg3[%c7, %c0_48, %c0_49] : memref<9x8x4xbf16, #tpu.memory_space<vmem>>, vector<1x8x4xbf16>
    %51 = vector.shape_cast %50 : vector<1x8x4xbf16> to vector<8x4xbf16>
    %cst_50 = arith.constant dense<0.000000e+00> : vector<8x128xf32>
    %52 = tpu.matmul %51, %45, %cst_50 {dimension_numbers = #tpu.dot_dimension_numbers<[1], [0], [0], [1], [0, 0, 1, 1], [], []>} : vector<8x4xbf16>, vector<4x128xbf16>, vector<8x128xf32> -> vector<8x128xf32>
    %53 = arith.addf %49, %52 : vector<8x128xf32>
    %54 = vector.extract_strided_slice %43 {offsets = [0, 1], sizes = [4, 127], strides = [1, 1]} : vector<4x128xbf16> to vector<4x127xbf16>
    %cst_51 = arith.constant 0.000000e+00 : bf16
    %55 = vector.broadcast %cst_51 : bf16 to vector<4x1xbf16>
    %56 = tpu.concatenate %54, %55 in 1 : vector<4x127xbf16>, vector<4x1xbf16> -> vector<4x128xbf16>
    %c8 = arith.constant 8 : index
    %c0_52 = arith.constant 0 : index
    %c0_53 = arith.constant 0 : index
    %57 = vector.load %arg3[%c8, %c0_52, %c0_53] : memref<9x8x4xbf16, #tpu.memory_space<vmem>>, vector<1x8x4xbf16>
    %58 = vector.shape_cast %57 : vector<1x8x4xbf16> to vector<8x4xbf16>
    %cst_54 = arith.constant dense<0.000000e+00> : vector<8x128xf32>
    %59 = tpu.matmul %58, %56, %cst_54 {dimension_numbers = #tpu.dot_dimension_numbers<[1], [0], [0], [1], [0, 0, 1, 1], [], []>} : vector<8x4xbf16>, vector<4x128xbf16>, vector<8x128xf32> -> vector<8x128xf32>
    %60 = arith.addf %53, %59 : vector<8x128xf32>
    %61 = tpu.iota {dimensions = array<i32: 1>} : vector<1x128xi32>
    %c16_i32 = arith.constant 16 : i32
    %c0_i32_55 = arith.constant 0 : i32
    %62 = arith.cmpi eq, %c16_i32, %c0_i32_55 : i32
    %c1_i32 = arith.constant 1 : i32
    %63 = arith.select %62, %c1_i32, %c16_i32 : i32
    %64 = vector.broadcast %63 : i32 to vector<1x128xi32>
    %65 = arith.remsi %61, %64 : vector<1x128xi32>
    %c0_i32_56 = arith.constant 0 : i32
    %66 = vector.broadcast %c0_i32_56 : i32 to vector<1x128xi32>
    %67 = arith.cmpi ne, %65, %66 : vector<1x128xi32>
    %c0_i32_57 = arith.constant 0 : i32
    %68 = vector.broadcast %c0_i32_57 : i32 to vector<1x128xi32>
    %69 = arith.cmpi slt, %65, %68 : vector<1x128xi32>
    %c0_i32_58 = arith.constant 0 : i32
    %70 = arith.cmpi slt, %63, %c0_i32_58 : i32
    %71 = vector.broadcast %70 : i1 to vector<1x128xi1>
    %72 = vector.broadcast %71 : vector<1x128xi1> to vector<1x128xi1>
    %73 = arith.xori %69, %72 : vector<1x128xi1>
    %74 = arith.andi %73, %67 : vector<1x128xi1>
    %75 = vector.broadcast %63 : i32 to vector<1x128xi32>
    %76 = arith.addi %65, %75 : vector<1x128xi32>
    %77 = arith.select %74, %76, %65 : vector<1x128xi1>, vector<1x128xi32>
    %c8_i32 = arith.constant 8 : i32
    %78 = vector.broadcast %c8_i32 : i32 to vector<1x128xi32>
    %79 = arith.cmpi slt, %77, %78 : vector<1x128xi32>
    %cst_59 = arith.constant 0.000000e+00 : f32
    %80 = vector.shape_cast %79 : vector<1x128xi1> to vector<1x128xi1>
    %81 = vector.broadcast %80 : vector<1x128xi1> to vector<8x128xi1>
    %82 = vector.broadcast %cst_59 : f32 to vector<8x128xf32>
    %83 = arith.select %81, %60, %82 : vector<8x128xi1>, vector<8x128xf32>
    %c0_60 = arith.constant 0 : index
    %c0_61 = arith.constant 0 : index
    %84 = vector.load %arg6[%c0_60, %c0_61] : memref<8x1xf32, #tpu.memory_space<vmem>>, vector<8x1xf32>
    %cst_62 = arith.constant dense<0.000000e+00> : vector<8xf32>
    %85 = vector.multi_reduction <add>, %83, %cst_62 [1] : vector<8x128xf32> to vector<8xf32>
    %86 = vector.shape_cast %85 : vector<8xf32> to vector<8x1xf32>
    %87 = arith.addf %84, %86 : vector<8x1xf32>
    %c0_63 = arith.constant 0 : index
    %c0_64 = arith.constant 0 : index
    %88 = vector.load %arg6[%c0_63, %c0_64] : memref<8x1xf32, #tpu.memory_space<vmem>>, vector<8x1xf32>
    tpu.vector_store %arg6[%c0_63, %c0_64], %87 {strides = array<i32>} : memref<8x1xf32, #tpu.memory_space<vmem>>, vector<8x1xf32>,
    %c0_65 = arith.constant 0 : index
    %c0_66 = arith.constant 0 : index
    %89 = vector.load %arg7[%c0_65, %c0_66] : memref<8x1xf32, #tpu.memory_space<vmem>>, vector<8x1xf32>
    %90 = arith.mulf %83, %83 : vector<8x128xf32>
    %cst_67 = arith.constant dense<0.000000e+00> : vector<8xf32>
    %91 = vector.multi_reduction <add>, %90, %cst_67 [1] : vector<8x128xf32> to vector<8xf32>
    %92 = vector.shape_cast %91 : vector<8xf32> to vector<8x1xf32>
    %93 = arith.addf %89, %92 : vector<8x1xf32>
    %c0_68 = arith.constant 0 : index
    %c0_69 = arith.constant 0 : index
    %94 = vector.load %arg7[%c0_68, %c0_69] : memref<8x1xf32, #tpu.memory_space<vmem>>, vector<8x1xf32>
    tpu.vector_store %arg7[%c0_68, %c0_69], %93 {strides = array<i32>} : memref<8x1xf32, #tpu.memory_space<vmem>>, vector<8x1xf32>,
    %c128_i32 = arith.constant 128 : i32
    %95 = arith.muli %arg2, %c128_i32 : i32
    %96 = tpu.assume_multiple %95, 128 : i32
    %97 = arith.truncf %60 : vector<8x128xf32> to vector<8x128xbf16>
    %c0_70 = arith.constant 0 : index
    %c0_71 = arith.constant 0 : index
    %98 = arith.index_cast %96 : i32 to index
    %99 = vector.load %arg5[%c0_70, %c0_71, %98] : memref<1x8x128xbf16, #tpu.memory_space<vmem>>, vector<1x8x128xbf16>
    %100 = vector.shape_cast %99 : vector<1x8x128xbf16> to vector<8x128xbf16>
    %101 = vector.shape_cast %97 : vector<8x128xbf16> to vector<1x8x128xbf16>
    tpu.vector_store %arg5[%c0_70, %c0_71, %98], %101 {strides = array<i32>} : memref<1x8x128xbf16, #tpu.memory_space<vmem>>, vector<1x8x128xbf16>,
    %c0_i32_72 = arith.constant 0 : i32
    %102 = arith.cmpi eq, %arg2, %c0_i32_72 : i32
    %103 = arith.extui %102 : i1 to i32
    %c0_i32_73 = arith.constant 0 : i32
    %104 = arith.cmpi ne, %103, %c0_i32_73 : i32
    scf.if %104 {
      %c0_74 = arith.constant 0 : index
      %c0_75 = arith.constant 0 : index
      %105 = vector.load %arg6[%c0_74, %c0_75] : memref<8x1xf32, #tpu.memory_space<vmem>>, vector<8x1xf32>
      %cst_76 = arith.constant 1.562500e-02 : f32
      %106 = vector.broadcast %cst_76 : f32 to vector<8x1xf32>
      %107 = arith.mulf %105, %106 : vector<8x1xf32>
      %c0_77 = arith.constant 0 : index
      %c0_78 = arith.constant 0 : index
      %108 = vector.load %arg7[%c0_77, %c0_78] : memref<8x1xf32, #tpu.memory_space<vmem>>, vector<8x1xf32>
      %cst_79 = arith.constant 1.562500e-02 : f32
      %109 = vector.broadcast %cst_79 : f32 to vector<8x1xf32>
      %110 = arith.mulf %108, %109 : vector<8x1xf32>
      %111 = arith.mulf %107, %107 : vector<8x1xf32>
      %112 = arith.subf %110, %111 : vector<8x1xf32>
      %cst_80 = arith.constant 0.000000e+00 : f32
      %113 = vector.broadcast %cst_80 : f32 to vector<8x1xf32>
      %114 = arith.maximumf %112, %113 : vector<8x1xf32>
      %cst_81 = arith.constant 9.99999974E-6 : f32
      %115 = vector.broadcast %cst_81 : f32 to vector<8x1xf32>
      %116 = arith.addf %114, %115 : vector<8x1xf32>
      %117 = math.rsqrt %116 : vector<8x1xf32>
      %c0_i32_82 = arith.constant 0 : i32
      %c128_i32_83 = arith.constant 128 : i32
      %118 = arith.muli %c0_i32_82, %c128_i32_83 : i32
      %119 = tpu.assume_multiple %118, 128 : i32
      %c0_84 = arith.constant 0 : index
      %c0_85 = arith.constant 0 : index
      %120 = arith.index_cast %119 : i32 to index
      %121 = vector.load %arg5[%c0_84, %c0_85, %120] : memref<1x8x128xbf16, #tpu.memory_space<vmem>>, vector<1x8x128xbf16>
      %122 = vector.shape_cast %121 : vector<1x8x128xbf16> to vector<8x128xbf16>
      %123 = arith.extf %122 : vector<8x128xbf16> to vector<8x128xf32>
      %124 = vector.broadcast %107 : vector<8x1xf32> to vector<8x128xf32>
      %125 = arith.subf %123, %124 : vector<8x128xf32>
      %126 = vector.broadcast %117 : vector<8x1xf32> to vector<8x128xf32>
      %127 = arith.mulf %125, %126 : vector<8x128xf32>
      %cst_86 = arith.constant 0.000000e+00 : f32
      %128 = vector.broadcast %cst_86 : f32 to vector<8x128xf32>
      %129 = arith.maximumf %127, %128 : vector<8x128xf32>
      %130 = arith.truncf %129 : vector<8x128xf32> to vector<8x128xbf16>
      %c0_87 = arith.constant 0 : index
      %c0_88 = arith.constant 0 : index
      %131 = arith.index_cast %119 : i32 to index
      %132 = vector.load %arg5[%c0_87, %c0_88, %131] : memref<1x8x128xbf16, #tpu.memory_space<vmem>>, vector<1x8x128xbf16>
      %133 = vector.shape_cast %132 : vector<1x8x128xbf16> to vector<8x128xbf16>
      %134 = vector.shape_cast %130 : vector<8x128xbf16> to vector<1x8x128xbf16>
      tpu.vector_store %arg5[%c0_87, %c0_88, %131], %134 {strides = array<i32>} : memref<1x8x128xbf16, #tpu.memory_space<vmem>>, vector<1x8x128xbf16>,
      %c1_i32_89 = arith.constant 1 : i32
    } else {
    }
    return
  }
  func.func @transform_0(%arg0: i32, %arg1: i32, %arg2: i32) -> (i32, i32, i32) {
    %c0_i32 = arith.constant 0 : i32
    %c0_i32_0 = arith.constant 0 : i32
    %c0_i32_1 = arith.constant 0 : i32
    return %c0_i32, %arg1, %c0_i32_0 : i32, i32, i32
  }
  func.func @transform_1(%arg0: i32, %arg1: i32, %arg2: i32) -> (i32, i32, i32, i32) {
    %c0_i32 = arith.constant 0 : i32
    %c0_i32_0 = arith.constant 0 : i32
    %c0_i32_1 = arith.constant 0 : i32
    return %arg0, %c0_i32, %c0_i32_0, %arg2 : i32, i32, i32, i32
  }
  func.func @transform_2(%arg0: i32, %arg1: i32, %arg2: i32) -> (i32, i32, i32) {
    %c0_i32 = arith.constant 0 : i32
    %c0_i32_0 = arith.constant 0 : i32
    return %arg0, %arg1, %c0_i32 : i32, i32, i32
  }
}

</mosaic_0001>

<bundles_post_ra>
// kernel: tpu_custom_call.1
= control target key start
LH: loop header
LB: loop body
LE: loop exit
PB: predicated region body
PF: predicated region fallthrough
CT: control target
= control target key end

     0   :  { %7 = vsyncpa [#allocation5], 0  ;;  %s1374_s0 = inlined_call_operand.vmem [shape: bf16[9,8,4], index: 0, kind: input, shape index: {}]   ;;  %s1375_s1 = inlined_call_operand.vmem [shape: bf16[2,6,4,128], index: 1, kind: input, shape index: {}]   ;;  %s1376_s2 = inlined_call_operand.hbm [shape: bf16[2,8,128], index: 2, kind: output, shape index: {}]  }
   0x1   :  { %9 = vsyncpa [#allocation5 + $0x1], 0  ;;  %s1161_s9 = smov 0   ;;  %s1163_s10 = smov 0  }
   0x2   :  { %s1165_s11 = smov 0   ;;  %s1167_s12 = smov 0  }
   0x3   :  { %s1169_s13 = smov 0   ;;  %s1171_s14 = smov 0  }
   0x4 LB: > { %s860_s15 = sadd.s32 4294967295, %s1138_s14   ;;  %s861_s16 = sadd.s32 4294967294, %s1138_s14   ;;  %s1138_s14 = sphi %s1171_s14, %s15_s14   ;;  %s1134_s13 = sphi %s1169_s13, %s1383_s13   ;;  %s1130_s12 = sphi %s1167_s12, %s1382_s12   ;;  %s1126_s11 = sphi %s1165_s11, %s1381_s11   ;;  %s1122_s10 = sphi %s1163_s10, %s1380_s10   ;;  %s1118_s9 = sphi %s1161_s9, %s1379_s9  }
   0x5   : > { %s34_s17 = sadd.s32 1, %s1134_s13  ;;  %s97_s18 = sadd.s32 1, %s1126_s11 }
   0x6   : > { %p36_p0 = scmp.ge.s32.totalorder %s34_s17, 2  ;;  %p107_p1 = scmp.ne.s32.totalorder %s1126_s11, %s1122_s10 }
   0x7   : > { %p108_p2 = scmp.eq.s32.totalorder %s860_s15, 1  ;;  %p113_p3 = scmp.ne.s32.totalorder %s1122_s10, %s1118_s9 }
   0x8   : > { %s1385_s17 = smov (%p36_p0, %s34_s17), 0  ;;  %p114_p5 = scmp.eq.s32.totalorder %s861_s16, 1 }
   0x9   : > { %p1201_p4 = por %p108_p2, %p107_p1  ;;  %s92_s20 = ssub.s32 %s1134_s13, %s1385_s17 }
   0xa   : > { %p865_p6 = scmp.ge.s32.totalorder %s1138_s14, 1  ;;  %p95_p7 = scmp.eq.s32.totalorder %s92_s20, 0 }
   0xb   : > { %p1208_p8 = por %p114_p5, %p113_p3  ;;  %p150_p9 = scmp.lt.s32.totalorder %s1138_s14, 3 }
   0xc   : > { %s1214_s22 = scalar_select %p95_p7, %s1126_s11, %s97_s18  }
   0xd   : > { %p151_p10 = pnand %p865_p6, %p150_p9 }
   0xe   : > { %p183_p11 = scmp.lt.s32.totalorder (!%p151_p10), %s1130_s12, 1  ;;  %v303_v0 = vlaneseq (!%p151_p10)  ;;  %v1140_v1 = vmov (!%p151_p10), 1983009808   ;;  %v1141_v3 = vmov (!%p151_p10), 0.0   ;;  %vm1142_vm0 = vmmov (!%p151_p10), 0   ;;  %s1143_s28 = smov (!%p151_p10), 127  }
   0xf   : > { %154 = sbr.rel (%p151_p10) target bundleno = 722 (0x2d2), region = 28  ;;  %v301_v2 = vunpack.c.l.s4 (!%p151_p10), %v1140_v1  ;;  %912 = vmatprep.subr.bf16.mxu1 (!%p151_p10), %v1141_v3  ;;  %936 = vmatprep.subr.bf16.mxu0 (!%p151_p10), %v1141_v3  ;;  %vm209_vm1 = vcmask (!%p151_p10), 1041408   ;;  %v869_v17 = vld [vmem:[%s1374_s0 + $0x4] sm:$0xf] (!%p151_p10)  ;;  %vm205_vm2 = vcmask (!%p151_p10), 31744   ;;  %vm309_vm3 = vcmask (!%p151_p10), 1039360  }
  0x10   : > { %v304_v4 = vshrl.u32 (!%p151_p10), %v303_v0, 7  ;;  %914 = vmatprep.mubr.msk.bf16.mxu1 (!%p151_p10), %vm1142_vm0, %v1141_v3  ;;  %938 = vmatprep.mubr.msk.bf16.mxu0 (!%p151_p10), %vm1142_vm0, %v1141_v3  ;;  %v878_v18 = vld [vmem:[%s1374_s0 + $0x10] sm:$0xf] (!%p151_p10)  ;;  %v202_v20 = vld [vmem:[%s1374_s0] sm:$0xf] (!%p151_p10)  ;;  %vm196_vm4 = vcmask (!%p151_p10), 7168  }
  0x11   : > { %v302_v5 = vunpack.c.0.s8 (!%p151_p10), %v301_v2  ;;  %v880_v24 = vld [vmem:[%s1374_s0 + $0x14] sm:$0xf] (!%p151_p10)  ;;  %v872_v29 = vld [vmem:[%s1374_s0 + $0x8] sm:$0xf] (!%p151_p10)  ;;  %v884_v32 = vld [vmem:[%s1374_s0 + $0x18] sm:$0xf] (!%p151_p10) }
  0x12   : > { %v876_v34 = vld [vmem:[%s1374_s0 + $0xc] sm:$0xf] (!%p151_p10)  ;;  %v886_v37 = vld [vmem:[%s1374_s0 + $0x1c] sm:$0xf] (!%p151_p10)  ;;  %v888_v39 = vld [vmem:[%s1374_s0 + $0x20] sm:$0xf] (!%p151_p10) }
  0x13   : > { %v305_v6 = vsub.s32 (!%p151_p10), %v302_v5, %v304_v4  ;;  %197 = vst.msk [vmem:[#allocation2] sm:$0xff] (!%p151_p10), %vm196_vm4, %v1141_v3  ;;  %198 = vst.msk [vmem:[#allocation3] sm:$0xff] (!%p151_p10), %vm196_vm4, %v1141_v3  ;;  %v686_v44 = vand.u32 (!%p151_p10), 127, %v303_v0  ;;  %s176_s29 = sand.u32 (!%p151_p10), 1, %s1122_s10   ;;  %v1144_v54 = vmov (!%p151_p10), 0   ;;  %s891_s4 = sshll.u32 (!%p151_p10), %s1130_s12, 6 }
  0x14   : > { %s866_s30 = sshll.u32 (!%p151_p10), %s176_s29, 2  ;;  %1056 = vset.pattern.permute.xlu0 (!%p151_p10), %v1144_v54  ;;  %1057 = vset.pattern.permute.xlu1 (!%p151_p10), %v1144_v54  ;;  %s1324_s8 = scalar_lea.hbm (!%p151_p10), %s1376_s2, %s891_s4 }
  0x15   : > { %v691_v45 = vand.u32 (!%p151_p10), 15, %v686_v44  ;;  %s1313_s3 = scalar_lea.vmem (!%p151_p10), [#allocation4], %s866_s30  ;;  %s752_s15 = scalar_lea.sflag (!%p151_p10), [#allocation5], %s176_s29 }
  0x16   : > { %s184_s23 = scalar_select %p183_p11, %s1130_s12, 1 }
  0x17   : > { %vm699_vm5 = vcmp.lt.s32.totalorder %v691_v45, 8  ;;  %s766_s5 = sshll.u32 %s1313_s3, 4  ;;  %s1145_s12 = smov [#allocation4]   ;;  %s1326_s5 = int_to_ptr.vmem [resolvable:$true] %s766_s5 }
  0x18   : > { %s995_s24 = smul.u32 12, %s184_s23  ;;  %s1060_s16 = scalar_lea.vmem %s1326_s5, 64 }
  0x19   : > { %p1061_p12 = scmp.ne.s32.totalorder %s1326_s5, %s1060_s16  ;;  %s1064_s18 = sshll.u32 %s1145_s12, 4  ;;  %s1065_s18 = int_to_ptr.vmem [resolvable:$false] %s1064_s18 }
  0x1a   : > { %s1228_s27 = scalar_lea.vmem %s1375_s1, %s995_s24  ;;  %v703_v55 = vld [vmem:[#allocation2] sm:$0xff]  ;;  %v709_v57 = vld [vmem:[#allocation3] sm:$0xff]  ;;  %s1066_s20 = scalar_lea.vmem %s1065_s18, 128 }
  0x1b   : > { %v874_v7 = vld [vmem:[%s1228_s27 + $0x4] sm:$0x3]  ;;  %v199_v8 = vld [vmem:[%s1228_s27] sm:$0x3]  ;;  %v882_v9 = vld [vmem:[%s1228_s27 + $0x8] sm:$0x3]  ;;  %p1062_p13 = pnand %p1061_p12, %p1201_p4  ;;  %p1067_p1 = scmp.lt.s32.totalorder %s1326_s5, %s1065_s18 }
  0x1c   : > { %v470_v10 = vrot.slane %v874_v7, %v305_v6  ;;  %v632_v11 = vrot.slane %v882_v9, %v305_v6  ;;  %v868_v12 = vld [vmem:[%s1228_s27 + $0x2] sm:$0x3]  ;;  %v875_v13 = vld [vmem:[%s1228_s27 + $0x6] sm:$0x3]  ;;  %v306_v16 = vrot.slane %v199_v8, %v305_v6  ;;  %v257_v19 = vsel %vm209_vm1, %v199_v8, 0  ;;  %p1068_p2 = scmp.lt.s32.totalorder %s1066_s20, %s1060_s16 }
  0x1d   : > { %v211_v14 = vsel %vm209_vm1, %v868_v12, 0  ;;  %v420_v15 = vsel %vm209_vm1, %v875_v13, 0  ;;  %v533_v26 = vsel %vm209_vm1, %v882_v9, 0  ;;  %v371_v30 = vsel %vm209_vm1, %v874_v7, 0  ;;  %v883_v31 = vld [vmem:[%s1228_s27 + $0xa] sm:$0x3]  ;;  %p1063_p0 = pneg %p1062_p13 }
  0x1e   : > { %471 = vrot.lane.b32.xlu0 %v470_v10, %s1143_s28  ;;  %633 = vrot.lane.b32.xlu1 %v632_v11, %s1143_s28  ;;  %v582_v33 = vsel %vm209_vm1, %v883_v31, 0  ;;  %p1069_p3 = por %p1068_p2, %p1067_p1 }
  0x1f   : > { %913 = vmatpush3.bf16.msra.mxu1 %v211_v14  ;;  %937 = vmatpush3.bf16.msra.mxu0 %v420_v15 }
  0x20   : > { %918 = vmatprep.subr.bf16.mxu1 %v1141_v3  ;;  %942 = vmatprep.subr.bf16.mxu0 %v1141_v3  ;;  %p1070_p5 = pnand %p1069_p3, %p1063_p0 }
  0x22   : > { %307 = vrot.lane.b32.xlu0 %v306_v16, %s1143_s28  ;;  %915 = vmatmul.mubr.msk.bf16.vlgmr.msra.gmra.mrb[0].mxu1 %vm205_vm2, %v869_v17 }
  0x23   : > { %939 = vmatmul.mubr.msk.bf16.vlgmr.msra.gmra.mrb[0].mxu0 %vm205_vm2, %v878_v18  ;;  %919 = vmatpush3.bf16.msra.mxu1 %v257_v19 }
  0x24   : > { %920 = vmatprep.mubr.msk.bf16.mxu1 %vm1142_vm0, %v1141_v3  ;;  %944 = vmatprep.mubr.msk.bf16.mxu0 %vm1142_vm0, %v1141_v3 }
  0x25   : > { %924 = vmatprep.subr.bf16.mxu1 %v1141_v3 }
  0x2e   : > { %921 = vmatmul.mubr.msk.bf16.vlgmr.msra.gmra.mrb[0].mxu1 %vm205_vm2, %v202_v20 }
  0x2f   : > { %926 = vmatprep.mubr.msk.bf16.mxu1 %vm1142_vm0, %v1141_v3 }
  0x90   : > { %v472_v21 = vpop.permute.xlu0 %471  ;;  %v634_v35 = vpop.permute.xlu1 %633 }
  0x91   : > { %v474_v22 = vsel %vm309_vm3, %v472_v21, 0  ;;  %v636_v36 = vsel %vm309_vm3, %v634_v35, 0 }
  0x92   : > { %v480_v23 = vsel %vm209_vm1, %v474_v22, 0  ;;  %v642_v38 = vsel %vm209_vm1, %v636_v36, 0 }
  0x93   : > { %943 = vmatpush3.bf16.msra.mxu0 %v480_v23 }
  0x94   : > { %v308_v25 = vpop.permute.xlu0 %307  ;;  %948 = vmatprep.subr.bf16.mxu0 %v1141_v3 }
  0x95   : > { %v312_v27 = vsel %vm309_vm3, %v308_v25, 0 }
  0x96   : > { %v318_v28 = vsel %vm209_vm1, %v312_v27, 0  ;;  %945 = vmatmul.mubr.msk.bf16.vlgmr.msra.gmra.mrb[0].mxu0 %vm205_vm2, %v880_v24 }
  0x97   : > { %925 = vmatpush3.bf16.msra.mxu1 %v318_v28  ;;  %949 = vmatpush3.bf16.msra.mxu0 %v533_v26 }
  0x98   : > { %950 = vmatprep.mubr.msk.bf16.mxu0 %vm1142_vm0, %v1141_v3  ;;  %930 = vmatprep.subr.bf16.mxu1 %v1141_v3 }
  0x99   : > { %954 = vmatprep.subr.bf16.mxu0 %v1141_v3 }
  0x9a   : > { %927 = vmatmul.mubr.msk.bf16.vlgmr.msra.gmra.mrb[0].mxu1 %vm205_vm2, %v872_v29 }
  0x9b   : > { %931 = vmatpush3.bf16.msra.mxu1 %v371_v30  ;;  %932 = vmatprep.mubr.msk.bf16.mxu1 %vm1142_vm0, %v1141_v3 }
  0xa2   : > { %951 = vmatmul.mubr.msk.bf16.vlgmr.msra.gmra.mrb[0].mxu0 %vm205_vm2, %v884_v32 }
  0xa3   : > { %955 = vmatpush3.bf16.msra.mxu0 %v582_v33  ;;  %956 = vmatprep.mubr.msk.bf16.mxu0 %vm1142_vm0, %v1141_v3 }
  0xa4   : > { %960 = vmatprep.subr.bf16.mxu0 %v1141_v3 }
  0xa6   : > { %933 = vmatmul.mubr.msk.bf16.vlgmr.msra.gmra.mrb[0].mxu1 %vm205_vm2, %v876_v34 }
  0xae   : > { %957 = vmatmul.mubr.msk.bf16.vlgmr.msra.gmra.mrb[0].mxu0 %vm205_vm2, %v886_v37 }
  0xaf   : > { %961 = vmatpush3.bf16.msra.mxu0 %v642_v38  ;;  %962 = vmatprep.mubr.msk.bf16.mxu0 %vm1142_vm0, %v1141_v3 }
  0xba   : > { %963 = vmatmul.mubr.msk.bf16.vlgmr.msra.gmra.mrb[0].mxu0 %vm205_vm2, %v888_v39 }
 0x179   : > { %v407_v40 = vpop.f32.mrb[0].mxu1 }
 0x17a   : > { %v934_v41 = vpop.f32.mrb[1].mxu1 }
 0x17b   : > { %v410_v42 = vpop.f32.mrb[2].mxu1 }
 0x17c   : > { %v935_v43 = vpop.f32.mrb[3].mxu1 }
 0x18d   : > { %v678_v46 = vpop.f32.mrb[0].mxu0 }
 0x18e   : > { %v966_v47 = vadd.f32 %v678_v46, %v407_v40  ;;  %v964_v48 = vpop.f32.mrb[1].mxu0 }
 0x18f   : > { %v681_v49 = vpop.f32.mrb[2].mxu0 }
 0x190   : > { %v716_v50 = vpack.c.bf16 %v966_v47, %v966_v47  ;;  %v965_v51 = vpop.f32.mrb[3].mxu0  ;;  %v702_v52 = vsel %vm699_vm5, %v966_v47, 0.0 }
 0x191   : > { %704 = vadd.xlane.f32.xlu1 %v702_v52  ;;  %v710_v53 = vmul.f32 %v702_v52, %v702_v52 }
 0x192   : > { %721 = vst [vmem:[%s1313_s3] sm:$0xf] %v716_v50 }
 0x193   : > { %711 = vadd.xlane.f32.xlu0 %v710_v53 }
 0x199   : > { %v734_v6 = vld [vmem:[%s1313_s3] sm:$0xf] }
 0x19a   : > { %v735_v8 = vunpack.c.l.bf16 %v734_v6 }
 0x21e   : > { %v705_v56 = vpop.xlane.xlu1 %704 }
 0x21f   : > { %v706_v58 = vadd.f32 %v705_v56, %v703_v55 }
 0x220   : > { %v712_v59 = vpop.xlane.xlu0 %711 }
 0x221   : > { %708 = vst.msk [vmem:[#allocation2] sm:$0xff] %vm196_vm4, %v706_v58  ;;  %v713_v60 = vadd.f32 %v712_v59, %v709_v57 }
 0x223   : > { %714 = vst.msk [vmem:[#allocation3] sm:$0xff] %vm196_vm4, %v713_v60 }
 0x228   : > { %v725_v61 = vld [vmem:[#allocation2] sm:$0xff] }
 0x229   : > { %v726_v62 = vmul.f32 0.015625, %v725_v61 }
 0x22a   : > { %v727_v63 = vld [vmem:[#allocation3] sm:$0xff] }
 0x22b   : > { %v729_v0 = vmul.f32 %v726_v62, %v726_v62  ;;  %738 = vperm.xlu0 %1056, %v726_v62   ;;  %v728_v1 = vmul.f32 0.015625, %v727_v63 }
 0x22d   : > { %v730_v2 = vsub.f32 %v728_v1, %v729_v0 }
 0x22f   : > { %v731_v3 = vmax.f32 %v730_v2, 0.0 }
 0x231   : > { %v732_v4 = vadd.f32 1e-05, %v731_v3 }
 0x233   : > { %1058 = vrsqrt.f32 %v732_v4 }
 0x23d   : > { %v1059_v5 = vpop.eup %1058 }
 0x23e   : > { %744 = vperm.xlu1 %1057, %v1059_v5  }
 0x2aa   : > { %v739_v7 = vpop.permute.xlu0 %738 }
 0x2ab   : > { %v741_v9 = vsub.f32 %v735_v8, %v739_v7 }
 0x2bd   : > { %v745_v10 = vpop.permute.xlu1 %744 }
 0x2be   : > { %v747_v11 = vmul.f32 %v745_v10, %v741_v9 }
 0x2c0   : > { %v748_v12 = vmax.f32 %v747_v11, 0.0 }
 0x2c2   : > { %v749_v13 = vpack.c.bf16 %v748_v12, %v748_v12 }
 0x2c4   : > { %750 = vst [vmem:[%s1313_s3] sm:$0xf] %v749_v13 }
 0x2c5   : > { %1073 = shalt.err (!%p1070_p5)
}
 0x2c6   : > { %s1074_s23 = scalar_lea.hbm %s1324_s8, 64  ;;  %s1078_s26 = scalar_lea.hbm %s1376_s2, 128 }
 0x2c7   : > { %p1075_p6 = scmp.ne.s32.totalorder %s1324_s8, %s1074_s23  ;;  %p1079_p10 = scmp.lt.u32.totalorder %s1324_s8, %s1376_s2 }
 0x2c8   : > { %p1080_p11 = scmp.lt.u32.totalorder %s1078_s26, %s1074_s23  ;;  %p1082_p13 = scmp.lt.u32.totalorder %s1074_s23, %s1324_s8 }
 0x2c9   : > { %p1076_p7 = pnand %p1075_p6, %p1201_p4 }
 0x2ca   : > { %p1081_p12 = por %p1080_p11, %p1079_p10 }
 0x2cb   : > { %p1077_p9 = pneg %p1076_p7 }
 0x2cc   : > { %p1083_p0 = por %p1082_p13, %p1081_p12 }
 0x2ce   : > { %p1084_p1 = pnand %p1083_p0, %p1077_p9 }
 0x2d0   : > { %1087 = shalt.err (!%p1084_p1)
}
 0x2d1   : > { %996 = dma.vmem_to_hbm [thread:$0]  (%p1201_p4), %s1326_s5, 64, %s1324_s8, %s752_s15  }
 0x2d2 PF: > { %p1002_p2 = scmp.ge.s32.totalorder %s1138_s14, 2  ;;  %s778_s29 = sand.u32 1, %s1118_s9  }
 0x2d3   : > { %s779_s30 = scalar_lea.sflag [#allocation5], %s778_s29 }
 0x2d4   : > { %p999_p3 = pnand %p1002_p2, %p1208_p8 }
 0x2d6   : > { %1113 = dma.done.wait (!%p999_p3), %s779_s30, 64  }
 0x2d7   : > { %1115 = vsyncadd (!%p999_p3), %s779_s30, 4294967232  ;;  %s15_s14 = sadd.s32 1, %s1138_s14   ;;  %s1379_s9 = smov %s1122_s10 }
 0x2d8   : > { %p12_p5 = scmp.ge.s32.totalorder %s15_s14, 4   ;;  %s1380_s10 = smov %s1126_s11 }
 0x2d9   : > { %s1381_s11 = smov %s1214_s22  ;;  %s1382_s12 = smov %s1134_s13 }
 0x2da   : > { %s1383_s13 = smov %s1385_s17  ;;  %14 = sbr.rel (!%p12_p5) target bundleno = 4 (0x4), region = 88 }
 0x2e1   :  { %784 = vsyncpa [#allocation5], 1 }
 0x2e2   :  { %786 = vsyncpa [#allocation5 + $0x1], 1 }

</bundles_post_ra>
